<compile_context>
chip_gen: v6e
topology: v6e:2x2x1
jax: 0.10.0
libtpu: 0.0.40
codegen_flags: <defaults>
</compile_context>

<pallas_src>
import functools

import jax
import jax.numpy as jnp
from jax.experimental import pallas as pl
from jax.experimental.pallas import tpu as pltpu


def _bn_relu_conv_kernel(x_ref, a_ref, b_ref, t_ref, bias_ref, o_ref, *, K, H, pad_lo):
    # x_ref:    (Nb, Hp, WpCp) fp32   zero-padded input rows of Nb images
    # a_ref:    (1, WpCp)      fp32   fused BN scale row (width-halo mask folded in)
    # b_ref:    (1, WpCp)      fp32   fused BN shift row (width-halo mask folded in)
    # t_ref:    (K*WpCp, WCo)  bf16   block-Toeplitz-lowered conv weight (W taps
    #                                 folded; K row taps stacked along rows)
    # bias_ref: (1, WCo)       fp32
    # o_ref:    (Nb*H, WCo)    fp32   lane-dense output slab
    Nb, Hp, WpCp = x_ref.shape

    # Fused BatchNorm (precomputed global stats folded into a/b) + affine + ReLU.
    # Width-halo lanes are zeroed by the mask folded into a/b; height-halo rows
    # are zeroed with a row-index mask (cheap VPU work; saves DMAing full
    # (Hp, WpC) maps).
    y = jnp.maximum(x_ref[...] * a_ref[...] + b_ref[...], 0.0)          # (Nb, Hp, WpCp)
    row = jax.lax.broadcasted_iota(jnp.int32, (Hp, WpCp), 0)
    y = jnp.where((row >= pad_lo) & (row < pad_lo + H), y, 0.0)

    # Stack the K row taps along the lane axis.  Each piece is a whole number of
    # 128-lane vregs (WpCp % 128 == 0), so the concat is alignment-free.  One MXU
    # matmul with M = Nb*H, bf16 operands, fp32 accumulation.
    y_cat = jnp.concatenate([y[:, dh:dh + H, :] for dh in range(K)], axis=-1)
    y_cat = y_cat.reshape(Nb * H, K * WpCp).astype(jnp.bfloat16)
    acc = jnp.dot(y_cat, t_ref[...], preferred_element_type=jnp.float32)

    o_ref[...] = (acc + bias_ref[...]).astype(o_ref.dtype)


def munit_norm_nlin_conv_forward(x_nchw, gamma, beta, w_oihw, bias,
                                 *, kernel_size=3, eps=1e-5, images_per_step=8):
    """x_nchw: (N, Cin, H, W) float32 -> (N, Cout, H, W) float32."""
    N, Cin, H, W = x_nchw.shape
    Cout = w_oihw.shape[0]
    K = kernel_size

    # PyTorch module padding: [(k-1)//2, k//2] per spatial dim (stride 1 defaults)
    pad_lo = (K - 1) // 2
    pad_hi = K // 2
    Hp = H + pad_lo + pad_hi                 # = H + K - 1
    Wp = W + pad_lo + pad_hi                 # = W + K - 1
    WpC = Wp * Cin
    WpCp = ((WpC + 127) // 128) * 128        # lane-pad so in-kernel concat is vreg-aligned
    WCo = W * Cout                           # 128 for defaults -> lane-dense output
    # TODO(synk): if W*Cout stops being a multiple of 128, pad it in the lowered
    #             layout instead of emitting a masked-store output slab.

    # Images per grid step: for big N this keeps several grid steps (software
    # pipelining + both v7x TensorCores); for tiny N we take one fat step since
    # raising matmul M is the bigger lever at small shapes.
    Nb = max(1, min(images_per_step, N))
    n_steps = -(-N // Nb)
    Npad = n_steps * Nb

    x = x_nchw.astype(jnp.float32)

    # ---- BatchNorm2d global batch stats (training mode, biased var), one pass ----
    mean = jnp.mean(x, axis=(0, 2, 3))                                   # (Cin,)
    var = jnp.mean(jnp.square(x), axis=(0, 2, 3)) - jnp.square(mean)     # (Cin,)
    scale_c = gamma.astype(jnp.float32) * jax.lax.rsqrt(var + eps)       # (Cin,)
    shift_c = beta.astype(jnp.float32) - mean * scale_c                  # (Cin,)

    # ---- NCHW -> zero-padded NHWC slab (Npad, Hp, WpCp) ----
    # Batch pad (for the grid) and spatial halo pad are one jnp.pad that fuses
    # into the transpose copy; the lane pad to WpCp is a second (fusible) pad.
    x_nhwc = jnp.transpose(x, (0, 2, 3, 1))
    x_pad = jnp.pad(x_nhwc, ((0, Npad - N), (pad_lo, pad_hi), (pad_lo, pad_hi), (0, 0)))
    x_flat = jnp.pad(x_pad.reshape(Npad, Hp, WpC), ((0, 0), (0, 0), (0, WpCp - WpC)))

    # ---- fused per-lane scale/shift rows, width-halo mask folded in ----
    col = jnp.arange(Wp)
    w_valid = ((col >= pad_lo) & (col < pad_lo + W)).astype(jnp.float32)  # (Wp,)
    lane_mask = jnp.repeat(w_valid, Cin)                                  # (WpC,)
    a_row = jnp.pad(jnp.tile(scale_c, Wp) * lane_mask, (0, WpCp - WpC))[None, :]
    b_row = jnp.pad(jnp.tile(shift_c, Wp) * lane_mask, (0, WpCp - WpC))[None, :]

    # ---- lowered conv weight: W taps folded into a block-Toeplitz matrix, then
    #      the K row taps stacked along the contraction axis (lane-padded rows).
    #      bf16 operand (fp32 accumulation in-kernel). ----
    # T[dh, w_in*Cin + ci, w_out*Cout + co] = W[dh, w_in - w_out, ci, co]
    #   for 0 <= w_in - w_out < K, else 0.
    w_hwio = jnp.transpose(w_oihw.astype(jnp.float32), (2, 3, 1, 0))      # (K,K,Cin,Cout)
    sel = (jnp.arange(Wp)[None, :, None] ==
           (jnp.arange(W)[None, None, :] + jnp.arange(K)[:, None, None])
           ).astype(jnp.float32)                                          # (K, Wp, W)
    t_mat = jnp.einsum('dio,hdck->hicok', sel, w_hwio).reshape(K, WpC, WCo)
    t_flat = jnp.pad(t_mat, ((0, 0), (0, WpCp - WpC), (0, 0))).reshape(K * WpCp, WCo)
    t_flat = t_flat.astype(jnp.bfloat16)

    bias_row = jnp.tile(bias.astype(jnp.float32), W)[None, :]             # (1, W*Cout)

    kernel = functools.partial(_bn_relu_conv_kernel, K=K, H=H, pad_lo=pad_lo)

    # Note: a/b/t/bias have constant index_maps, so Pallas does not re-DMA them
    # across grid steps (pl.Buffered(1) would only trim their double-buffer VMEM).
    out_flat = pl.pallas_call(
        kernel,
        out_shape=jax.ShapeDtypeStruct((Npad * H, WCo), jnp.float32),
        grid=(n_steps,),
        in_specs=[
            pl.BlockSpec((Nb, Hp, WpCp), lambda n: (n, 0, 0)),   # Nb images / step
            pl.BlockSpec((1, WpCp), lambda n: (0, 0)),           # fused scale row
            pl.BlockSpec((1, WpCp), lambda n: (0, 0)),           # fused shift row
            pl.BlockSpec((K * WpCp, WCo), lambda n: (0, 0)),     # lowered weight
            pl.BlockSpec((1, WCo), lambda n: (0, 0)),            # bias row
        ],
        out_specs=pl.BlockSpec((Nb * H, WCo), lambda n: (n, 0)),
        compiler_params=pltpu.CompilerParams(
            dimension_semantics=("parallel",)),
    )(x_flat, a_row, b_row, t_flat, bias_row)

    out = out_flat.reshape(Npad, H, W, Cout)[:N]
    return jnp.transpose(out, (0, 3, 1, 2))                               # -> NCHW


def _reference_forward(x_nchw, gamma, beta, w_oihw, bias, *, kernel_size=3, eps=1e-5):
    """Pure-JAX reference (same math as the PyTorch module, training-mode BN)."""
    x = x_nchw.astype(jnp.float32)
    mean = jnp.mean(x, axis=(0, 2, 3), keepdims=True)
    var = jnp.mean((x - mean) ** 2, axis=(0, 2, 3), keepdims=True)
    y = (x - mean) * jax.lax.rsqrt(var + eps)
    y = y * gamma.reshape(1, -1, 1, 1) + beta.reshape(1, -1, 1, 1)
    y = jnp.maximum(y, 0.0)
    K = kernel_size
    pad_lo, pad_hi = (K - 1) // 2, K // 2
    out = jax.lax.conv_general_dilated(
        y, w_oihw.astype(jnp.float32), window_strides=(1, 1),
        padding=((pad_lo, pad_hi), (pad_lo, pad_hi)),
        dimension_numbers=("NCHW", "OIHW", "NCHW"))
    return out + bias.reshape(1, -1, 1, 1)


if __name__ == "__main__":
    # Small shapes consistent with the module: batch=2, in=4, out=8, spatial=16, k=3
    N, Cin, Cout, H, W, K = 2, 4, 8, 16, 16, 3
    key = jax.random.PRNGKey(0)
    kx, kw, kb, kg, kbt = jax.random.split(key, 5)

    x = jax.random.normal(kx, (N, Cin, H, W), dtype=jnp.float32)

    # BatchNorm affine params (PyTorch init: gamma=1, beta=0; perturb a bit so the
    # affine path is actually exercised, deterministically)
    gamma = 1.0 + 0.1 * jax.random.normal(kg, (Cin,), dtype=jnp.float32)
    beta = 0.1 * jax.random.normal(kbt, (Cin,), dtype=jnp.float32)

    # Conv2d weight (OIHW), kaiming_normal_-style std, deterministic bias
    fan_in = Cin * K * K
    w = jax.random.normal(kw, (Cout, Cin, K, K), dtype=jnp.float32) * jnp.sqrt(2.0 / fan_in)
    b = jax.random.uniform(kb, (Cout,), dtype=jnp.float32,
                           minval=-1.0 / jnp.sqrt(fan_in), maxval=1.0 / jnp.sqrt(fan_in))

    out = munit_norm_nlin_conv_forward(x, gamma, beta, w, b, kernel_size=K)
    out = jax.block_until_ready(out)

    ref = _reference_forward(x, gamma, beta, w, b, kernel_size=K)
    assert out.shape == (N, Cout, H, W), out.shape
    err = float(jnp.max(jnp.abs(out - ref)))
    # bf16 MXU operands (per perf review) with fp32 accumulation: tolerance vs. the
    # exact-fp32 reference is loosened accordingly (a structural/tap bug would be
    # orders of magnitude larger than this bound).
    assert jnp.allclose(out, ref, rtol=5e-2, atol=5e-2), err

    print("KERNEL_OK")
</pallas_src>

<mosaic_0001>
module attributes {stable_mosaic.version = 11 : i64} {
  func.func @_bn_relu_conv_kernel(%arg0: i32, %arg1: memref<2x18x128xf32, #tpu.memory_space<vmem>>, %arg2: memref<1x128xf32, #tpu.memory_space<vmem>>, %arg3: memref<1x128xf32, #tpu.memory_space<vmem>>, %arg4: memref<384x128xbf16, #tpu.memory_space<vmem>>, %arg5: memref<1x128xf32, #tpu.memory_space<vmem>>, %arg6: memref<32x128xf32, #tpu.memory_space<vmem>>) attributes {dimension_semantics = [#tpu.dimension_semantics<parallel>], iteration_bounds = array<i64: 1>, scalar_prefetch = 0 : i64, scratch_operands = 0 : i64, tpu.core_type = #tpu.core_type<tc>, window_params = [{transform_indices = @transform_0, window_bounds = array<i64: 2, 18, 128>}, {pipeline_mode = #tpu.pipeline_mode<synchronous>, transform_indices = @transform_1, window_bounds = array<i64: 1, 128>}, {pipeline_mode = #tpu.pipeline_mode<synchronous>, transform_indices = @transform_2, window_bounds = array<i64: 1, 128>}, {pipeline_mode = #tpu.pipeline_mode<synchronous>, transform_indices = @transform_3, window_bounds = array<i64: 384, 128>}, {pipeline_mode = #tpu.pipeline_mode<synchronous>, transform_indices = @transform_4, window_bounds = array<i64: 1, 128>}, {transform_indices = @transform_5, window_bounds = array<i64: 32, 128>}]} {
    %c0 = arith.constant 0 : index
    %c0_0 = arith.constant 0 : index
    %c0_1 = arith.constant 0 : index
    %0 = vector.load %arg1[%c0, %c0_0, %c0_1] : memref<2x18x128xf32, #tpu.memory_space<vmem>>, vector<2x18x128xf32>
    %c0_2 = arith.constant 0 : index
    %c0_3 = arith.constant 0 : index
    %1 = vector.load %arg2[%c0_2, %c0_3] : memref<1x128xf32, #tpu.memory_space<vmem>>, vector<1x128xf32>
    %2 = vector.shape_cast %1 : vector<1x128xf32> to vector<1x1x128xf32>
    %3 = vector.broadcast %2 : vector<1x1x128xf32> to vector<2x18x128xf32>
    %4 = arith.mulf %0, %3 : vector<2x18x128xf32>
    %c0_4 = arith.constant 0 : index
    %c0_5 = arith.constant 0 : index
    %5 = vector.load %arg3[%c0_4, %c0_5] : memref<1x128xf32, #tpu.memory_space<vmem>>, vector<1x128xf32>
    %6 = vector.shape_cast %5 : vector<1x128xf32> to vector<1x1x128xf32>
    %7 = vector.broadcast %6 : vector<1x1x128xf32> to vector<2x18x128xf32>
    %8 = arith.addf %4, %7 : vector<2x18x128xf32>
    %cst = arith.constant 0.000000e+00 : f32
    %9 = vector.broadcast %cst : f32 to vector<2x18x128xf32>
    %10 = arith.maximumf %8, %9 : vector<2x18x128xf32>
    %11 = tpu.iota {dimensions = array<i32: 0>} : vector<18x128xi32>
    %c1_i32 = arith.constant 1 : i32
    %12 = vector.broadcast %c1_i32 : i32 to vector<18x128xi32>
    %13 = arith.cmpi sge, %11, %12 : vector<18x128xi32>
    %c17_i32 = arith.constant 17 : i32
    %14 = vector.broadcast %c17_i32 : i32 to vector<18x128xi32>
    %15 = arith.cmpi slt, %11, %14 : vector<18x128xi32>
    %16 = arith.andi %13, %15 : vector<18x128xi1>
    %cst_6 = arith.constant 0.000000e+00 : f32
    %17 = vector.shape_cast %16 : vector<18x128xi1> to vector<1x18x128xi1>
    %18 = vector.broadcast %17 : vector<1x18x128xi1> to vector<2x18x128xi1>
    %19 = vector.broadcast %cst_6 : f32 to vector<2x18x128xf32>
    %20 = arith.select %18, %10, %19 : vector<2x18x128xi1>, vector<2x18x128xf32>
    %21 = vector.extract_strided_slice %20 {offsets = [0, 0, 0], sizes = [2, 16, 128], strides = [1, 1, 1]} : vector<2x18x128xf32> to vector<2x16x128xf32>
    %22 = vector.extract_strided_slice %20 {offsets = [0, 1, 0], sizes = [2, 16, 128], strides = [1, 1, 1]} : vector<2x18x128xf32> to vector<2x16x128xf32>
    %23 = vector.extract_strided_slice %20 {offsets = [0, 2, 0], sizes = [2, 16, 128], strides = [1, 1, 1]} : vector<2x18x128xf32> to vector<2x16x128xf32>
    %24 = tpu.concatenate %21, %22, %23 in 2 : vector<2x16x128xf32>, vector<2x16x128xf32>, vector<2x16x128xf32> -> vector<2x16x384xf32>
    %25 = vector.shape_cast %24 : vector<2x16x384xf32> to vector<32x384xf32>
    %26 = arith.truncf %25 : vector<32x384xf32> to vector<32x384xbf16>
    %c0_7 = arith.constant 0 : index
    %c0_8 = arith.constant 0 : index
    %27 = vector.load %arg4[%c0_7, %c0_8] : memref<384x128xbf16, #tpu.memory_space<vmem>>, vector<384x128xbf16>
    %cst_9 = arith.constant dense<0.000000e+00> : vector<32x128xf32>
    %28 = tpu.matmul %26, %27, %cst_9 {dimension_numbers = #tpu.dot_dimension_numbers<[1], [0], [0], [1], [0, 0, 1, 1], [], []>} : vector<32x384xbf16>, vector<384x128xbf16>, vector<32x128xf32> -> vector<32x128xf32>
    %c0_10 = arith.constant 0 : index
    %c0_11 = arith.constant 0 : index
    %29 = vector.load %arg5[%c0_10, %c0_11] : memref<1x128xf32, #tpu.memory_space<vmem>>, vector<1x128xf32>
    %30 = vector.broadcast %29 : vector<1x128xf32> to vector<32x128xf32>
    %31 = arith.addf %28, %30 : vector<32x128xf32>
    %c0_12 = arith.constant 0 : index
    %c0_13 = arith.constant 0 : index
    %32 = vector.load %arg6[%c0_12, %c0_13] : memref<32x128xf32, #tpu.memory_space<vmem>>, vector<32x128xf32>
    tpu.vector_store %arg6[%c0_12, %c0_13], %31 {strides = array<i32>} : memref<32x128xf32, #tpu.memory_space<vmem>>, vector<32x128xf32>,
    return
  }
  func.func @transform_0(%arg0: i32) -> (i32, i32, i32) {
    %c0_i32 = arith.constant 0 : i32
    %c0_i32_0 = arith.constant 0 : i32
    %c0_i32_1 = arith.constant 0 : i32
    return %arg0, %c0_i32, %c0_i32_0 : i32, i32, i32
  }
  func.func @transform_1(%arg0: i32) -> (i32, i32) {
    %c0_i32 = arith.constant 0 : i32
    %c0_i32_0 = arith.constant 0 : i32
    %c0_i32_1 = arith.constant 0 : i32
    return %c0_i32, %c0_i32_0 : i32, i32
  }
  func.func @transform_2(%arg0: i32) -> (i32, i32) {
    %c0_i32 = arith.constant 0 : i32
    %c0_i32_0 = arith.constant 0 : i32
    %c0_i32_1 = arith.constant 0 : i32
    return %c0_i32, %c0_i32_0 : i32, i32
  }
  func.func @transform_3(%arg0: i32) -> (i32, i32) {
    %c0_i32 = arith.constant 0 : i32
    %c0_i32_0 = arith.constant 0 : i32
    %c0_i32_1 = arith.constant 0 : i32
    return %c0_i32, %c0_i32_0 : i32, i32
  }
  func.func @transform_4(%arg0: i32) -> (i32, i32) {
    %c0_i32 = arith.constant 0 : i32
    %c0_i32_0 = arith.constant 0 : i32
    %c0_i32_1 = arith.constant 0 : i32
    return %c0_i32, %c0_i32_0 : i32, i32
  }
  func.func @transform_5(%arg0: i32) -> (i32, i32) {
    %c0_i32 = arith.constant 0 : i32
    %c0_i32_0 = arith.constant 0 : i32
    return %arg0, %c0_i32 : i32, i32
  }
}

</mosaic_0001>

<bundles_post_ra>
// kernel: tpu_custom_call.1
= control target key start
LH: loop header
LB: loop body
LE: loop exit
PB: predicated region body
PF: predicated region fallthrough
CT: control target
= control target key end

     0   :  { %10 = vsyncpa [#allocation3], 0  ;;  %s723_s0 = inlined_call_operand.vmem [shape: f32[2,18,128], index: 0, kind: input, shape index: {}]   ;;  %s724_s1 = inlined_call_operand.vmem [shape: f32[1,128], index: 1, kind: input, shape index: {}]   ;;  %s725_s2 = inlined_call_operand.vmem [shape: f32[1,128], index: 2, kind: input, shape index: {}]   ;;  %s726_s3 = inlined_call_operand.hbm [shape: bf16[384,128], index: 3, kind: input, shape index: {}]   ;;  %s727_s4 = inlined_call_operand.vmem [shape: f32[1,128], index: 4, kind: input, shape index: {}]   ;;  %s728_s5 = inlined_call_operand.hbm [shape: f32[32,128], index: 5, kind: output, shape index: {}]  }
   0x1   :  { %11 = vsyncpa [#allocation4], 0  ;;  %s625_s18 = smov [#allocation2]  }
   0x2   :  { %s23_s19 = sshll.u32 %s625_s18, 4  ;;  %s24_s19 = int_to_ptr.vmem [resolvable:$true] %s23_s19 }
   0x3   :  { %s589_s20 = scalar_lea.vmem %s24_s19, 3072  ;;  %p594_p1 = scmp.lt.s32.totalorder %s24_s19, %s24_s19 }
   0x4   :  { %p590_p0 = scmp.ne.s32.totalorder %s24_s19, %s589_s20  ;;  %p595_p2 = scmp.lt.s32.totalorder %s589_s20, %s589_s20 }
   0x6   :  { %p596_p3 = por %p595_p2, %p594_p1 }
   0x8   :  { %p597_p4 = pnand %p596_p3, %p590_p0 }
   0xa   :  { %600 = shalt.err (!%p597_p4)
}
   0xb   :  { %s626_s21 = smov 64   ;;  %s627_s22 = smov 4  }
   0xc   :  { %29 = dma.hbm_to_vmem [thread:$0]  %s726_s3, 3072, %s24_s19, [#allocation3], %s626_s21, %s626_s21, %s627_s22  }
   0xd   :  { %621 = dma.done.wait [#allocation3], 3072  }
   0xe   :  { %622 = vsyncadd [#allocation3], 4294964224  ;;  %v557_v0 = vld [vmem:[#allocation2 + $0x78] sm:$0xff]   ;;  %v559_v2 = vld [vmem:[#allocation2 + $0x70] sm:$0xff]   ;;  %v74_v15 = vlaneseq  ;;  %vm105_vm0 = vcmask 1046528   ;;  %vm120_vm3 = vcmask 1045504  }
   0xf   :  { %v558_v1 = vld [vmem:[#allocation2 + $0x38] sm:$0xff]   ;;  %492 = vmatprep.subr.bf16.mxu0 %v557_v0  ;;  %v561_v4 = vld [vmem:[#allocation2 + $0x30] sm:$0xff]   ;;  %v562_v5 = vld [vmem:[#allocation2 + $0x68] sm:$0xff]   ;;  %vm628_vm4 = vmmov 1  }
  0x10   :  { %493 = vmatpush3.bf16.msra.mxu0 %v558_v1  ;;  %v560_v3 = vld [vmem:[#allocation2 + $0xb8] sm:$0xff]   ;;  %v563_v6 = vld [vmem:[#allocation2 + $0xb0] sm:$0xff]   ;;  %v564_v7 = vld [vmem:[#allocation2 + $0x28] sm:$0xff]   ;;  %v665_v19 = vshrl.u32 %v74_v15, 7 }
  0x11   :  { %494 = vmatprep.subr.bf16.mxu0 %v559_v2  ;;  %530 = vmatprep.subr.bf16.mxu1 %v560_v3  ;;  %v565_v8 = vld [vmem:[#allocation2 + $0x60] sm:$0xff]   ;;  %v566_v9 = vld [vmem:[#allocation2 + $0xa8] sm:$0xff]   ;;  %v568_v11 = vld [vmem:[#allocation2 + $0x58] sm:$0xff]  }
  0x12   :  { %531 = vmatpush3.bf16.msra.mxu1 %v560_v3  ;;  %v567_v10 = vld [vmem:[#allocation2 + $0x20] sm:$0xff]   ;;  %v570_v13 = vld [vmem:[#allocation2 + $0x18] sm:$0xff]   ;;  %v571_v16 = vld [vmem:[#allocation2 + $0x50] sm:$0xff]   ;;  %v77_v27 = vadd.s32 16, %v665_v19  ;;  %vm78_vm1 = vcmp.ge.s32.totalorder %v665_v19, 1 }
  0x13   :  { %532 = vmatprep.subr.bf16.mxu1 %v563_v6  ;;  %v569_v12 = vld [vmem:[#allocation2 + $0xa0] sm:$0xff]   ;;  %v572_v14 = vld [vmem:[#allocation2 + $0x98] sm:$0xff]   ;;  %v573_v17 = vld [vmem:[#allocation2 + $0x10] sm:$0xff]  }
  0x14   :  { %495 = vmatpush3.bf16.msra.mxu0 %v561_v4  ;;  %v575_v18 = vld [vmem:[#allocation2 + $0x90] sm:$0xff]   ;;  %v574_v20 = vld [vmem:[#allocation2 + $0x48] sm:$0xff]   ;;  %v577_v22 = vld [vmem:[#allocation2 + $0x40] sm:$0xff]   ;;  %vm83_vm2 = vcmp.lt.s32.totalorder %v77_v27, 17 }
  0x15   :  { %496 = vmatprep.subr.bf16.mxu0 %v562_v5  ;;  %v576_v21 = vld [vmem:[#allocation2 + $0x8] sm:$0xff]   ;;  %v36_v24 = vld [vmem:[%s723_s0] sm:$0xff]  ;;  %v38_v26 = vld [vmem:[%s723_s0 + $0x10] sm:$0x3] }
  0x16   :  { %533 = vmatpush3.bf16.msra.mxu1 %v563_v6  ;;  %v578_v23 = vld [vmem:[#allocation2 + $0x88] sm:$0xff]   ;;  %v459_v29 = vld [vmem:[%s724_s1] ss:$0 sm:$0xff]  ;;  %v39_v35 = vld [vmem:[%s723_s0 + $0x18] sm:$0xff] }
  0x17   :  { %534 = vmatprep.subr.bf16.mxu1 %v566_v9  ;;  %v37_v25 = vld [vmem:[%s723_s0 + $0x8] sm:$0xff]  ;;  %v460_v30 = vld [vmem:[%s725_s2] ss:$0 sm:$0xff]  ;;  %v49_v31 = vmul.f32 %v459_v29, %v36_v24  ;;  %v51_v33 = vmul.f32 %v459_v29, %v38_v26  ;;  %v52_v43 = vmul.f32 %v459_v29, %v39_v35  ;;  %vm701_vm5 = vmpackc.low %vm628_vm4, %vm78_vm1  ;;  %s629_s2 = smov [#allocation5]  }
  0x18   :  { %497 = vmatpush3.bf16.msra.mxu0 %v564_v7  ;;  %v41_v28 = vld [vmem:[%s723_s0 + $0x28] sm:$0x3]  ;;  %v50_v32 = vmul.f32 %v459_v29, %v37_v25  ;;  %v40_v36 = vld [vmem:[%s723_s0 + $0x20] sm:$0xff] }
  0x19   :  { %498 = vmatprep.subr.bf16.mxu0 %v565_v8  ;;  %v54_v34 = vmul.f32 %v459_v29, %v41_v28  ;;  %v579_v37 = vld [vmem:[#allocation2] sm:$0xff]   ;;  %v62_v38 = vadd.f32 %v460_v30, %v49_v31  ;;  %v64_v40 = vadd.f32 %v460_v30, %v51_v33  ;;  %v53_v44 = vmul.f32 %v459_v29, %v40_v36 }
  0x1a   :  { %535 = vmatpush3.bf16.msra.mxu1 %v566_v9  ;;  %v63_v39 = vadd.f32 %v460_v30, %v50_v32  ;;  %v580_v41 = vld [vmem:[#allocation2 + $0x80] sm:$0xff]   ;;  %v65_v49 = vadd.f32 %v460_v30, %v52_v43 }
  0x1b   :  { %536 = vmatprep.subr.bf16.mxu1 %v569_v12  ;;  %v67_v42 = vadd.f32 %v460_v30, %v54_v34  ;;  %v68_v45 = vmax.f32 %v62_v38, 0.0  ;;  %v70_v47 = vmax.f32 %v64_v40, 0.0  ;;  %v66_v50 = vadd.f32 %v460_v30, %v53_v44 }
  0x1c   :  { %499 = vmatpush3.bf16.msra.mxu0 %v567_v10  ;;  %v69_v46 = vmax.f32 %v63_v39, 0.0  ;;  %v71_v61 = vmax.f32 %v65_v49, 0.0 }
  0x1d   :  { %500 = vmatprep.subr.bf16.mxu0 %v568_v11  ;;  %v73_v48 = vmax.f32 %v67_v42, 0.0  ;;  %v93_v51 = vsel %vm78_vm1, %v68_v45, 0.0  ;;  %v95_v52 = vsel %vm83_vm2, %v70_v47, 0.0  ;;  %v72_v62 = vmax.f32 %v66_v50, 0.0 }
  0x1e   :  { %537 = vmatpush3.bf16.msra.mxu1 %v569_v12  ;;  %v107_v53 = vrot.slane %v69_v46, 1  ;;  %v487_v54 = vpack.c.bf16 %v69_v46, %v68_v45  ;;  %v106_v56 = vrot.slane %v93_v51, 1  ;;  %v109_v57 = vrot.slane %v95_v52, 1 }
  0x1f   :  { %538 = vmatprep.subr.bf16.mxu1 %v572_v14  ;;  %v98_v55 = vsel %vm83_vm2, %v73_v48, 0.0  ;;  %v121_v58 = vrot.slane %v93_v51, 2  ;;  %v122_v59 = vrot.slane %v69_v46, 2  ;;  %v124_v60 = vrot.slane %v95_v52, 2 }
  0x20   :  { %501 = vmatpush3.bf16.msra.mxu0 %v570_v13  ;;  %v108_v63 = vsel %vm105_vm0, %v106_v56, %v107_v53  ;;  %v110_v0 = vsel %vm105_vm0, %v107_v53, %v109_v57  ;;  %v129_v1 = vrot.slane %v98_v55, 2  ;;  %v114_v2 = vrot.slane %v98_v55, 1 }
  0x21   :  { %502 = vmatprep.subr.bf16.mxu0 %v571_v16  ;;  %v136_v3 = vpack.c.bf16 %v110_v0, %v108_v63  ;;  %v123_v5 = vsel %vm120_vm3, %v121_v58, %v122_v59  ;;  %v125_v6 = vsel %vm120_vm3, %v122_v59, %v124_v60  ;;  %v96_v7 = vsel %vm78_vm1, %v71_v61, 0.0 }
  0x22   :  { %539 = vmatpush3.bf16.msra.mxu1 %v572_v14  ;;  %v137_v8 = vpack.c.bf16 %v125_v6, %v123_v5  ;;  %v126_v9 = vrot.slane %v96_v7, 2  ;;  %v127_v10 = vrot.slane %v72_v62, 2  ;;  %v111_v11 = vrot.slane %v96_v7, 1 }
  0x23   :  { %540 = vmatprep.subr.bf16.mxu1 %v575_v18  ;;  %372 = vmatprep.mubr.bf16.mxu0 %v136_v3  ;;  %v112_v12 = vrot.slane %v72_v62, 1  ;;  %v490_v19 = vpack.c.bf16 %v72_v62, %v71_v61 }
  0x24   :  { %503 = vmatpush3.bf16.msra.mxu0 %v573_v17  ;;  %546 = vmatprep.mubr.bf16.mxu1 %v137_v8  ;;  %v128_v13 = vsel %vm120_vm3, %v126_v9, %v127_v10  ;;  %v130_v14 = vsel %vm120_vm3, %v127_v10, %v129_v1 }
  0x25   :  { %504 = vmatprep.subr.bf16.mxu0 %v574_v20  ;;  %v140_v15 = vpack.c.bf16 %v130_v14, %v128_v13  ;;  %v113_v16 = vsel %vm105_vm0, %v111_v11, %v112_v12  ;;  %v115_v17 = vsel %vm105_vm0, %v112_v12, %v114_v2 }
  0x26   :  { %541 = vmatpush3.bf16.msra.mxu1 %v575_v18  ;;  %v139_v18 = vpack.c.bf16 %v115_v17, %v113_v16 }
  0x27   :  { %542 = vmatprep.subr.bf16.mxu1 %v578_v23 }
  0x28   :  { %505 = vmatpush3.bf16.msra.mxu0 %v576_v21 }
  0x29   :  { %506 = vmatprep.subr.bf16.mxu0 %v577_v22  ;;  %v461_v22 = vld [vmem:[%s727_s4] ss:$0 sm:$0xff]  ;;  %s447_s4 = sshll.u32 %s629_s2, 4  ;;  %s448_s4 = int_to_ptr.vmem [resolvable:$true] %s447_s4 }
  0x2a   :  { %543 = vmatpush3.bf16.msra.mxu1 %v578_v23  ;;  %s601_s15 = scalar_lea.vmem %s448_s4, 512  ;;  %p606_p6 = scmp.lt.s32.totalorder %s448_s4, %s448_s4 }
  0x2b   :  { %544 = vmatprep.subr.bf16.mxu1 %v580_v41  ;;  %p602_p5 = scmp.ne.s32.totalorder %s448_s4, %s601_s15  ;;  %p607_p7 = scmp.lt.s32.totalorder %s601_s15, %s601_s15 }
  0x2c   :  { %507 = vmatpush3.bf16.msra.mxu0 %v579_v37 }
  0x2d   :  { %p608_p8 = por %p607_p7, %p606_p6 }
  0x2e   :  { %545 = vmatpush3.bf16.msra.mxu1 %v580_v41 }
  0x2f   :  { %488 = vmatmul.mubr.msk.bf16.vlgmr.msra.gmra.mxu0 %vm701_vm5, %v487_v54  ;;  %p609_p9 = pnand %p608_p8, %p602_p5 }
  0x30   :  { %380 = vmatprep.mubr.bf16.mxu0 %v139_v18 }
  0x31   :  { %547 = vmatmul.mubr.bf16.vlgmr.msra.gmra.mxu1 %v140_v15 }
  0x37   :  { %491 = vmatmul.mubr.msk.bf16.gmra.mxu0 %vm701_vm5, %v490_v19 }
  0xef   :  { %v508_v20 = vpop.f32.mrf.mxu0 }
  0xf1   :  { %v509_v21 = vpop.f32.mrf.mxu0  ;;  %v548_v24 = vpop.f32.mrf.mxu1 }
  0xf2   :  { %v510_v23 = vadd.f32 %v509_v21, %v508_v20 }
  0xf3   :  { %v511_v25 = vpop.f32.mrf.mxu0  ;;  %v423_v27 = vpop.f32.mrf.mxu1 }
  0xf4   :  { %v375_v26 = vadd.f32 %v510_v23, %v461_v22 }
  0xf5   :  { %v512_v28 = vpop.f32.mrf.mxu0  ;;  %v549_v31 = vpop.f32.mrf.mxu1 }
  0xf6   :  { %v513_v29 = vadd.f32 %v512_v28, %v511_v25  ;;  %v424_v30 = vadd.f32 %v423_v27, %v375_v26 }
  0xf7   :  { %v514_v32 = vpop.f32.mrf.mxu0  ;;  %v426_v34 = vpop.f32.mrf.mxu1 }
  0xf8   :  { %438 = vst [vmem:[#allocation5] sm:$0xff] %v424_v30  ;;  %v378_v33 = vadd.f32 %v513_v29, %v461_v22 }
  0xf9   :  { %v515_v35 = vpop.f32.mrf.mxu0 }
  0xfa   :  { %v516_v36 = vadd.f32 %v515_v35, %v514_v32  ;;  %v427_v37 = vadd.f32 %v426_v34, %v378_v33 }
  0xfb   :  { %v517_v38 = vpop.f32.mrf.mxu0 }
  0xfc   :  { %v383_v39 = vadd.f32 %v516_v36, %v461_v22  ;;  %439 = vst [vmem:[#allocation5 + $0x8] sm:$0xff] %v427_v37 }
  0xfd   :  { %v518_v40 = vpop.f32.mrf.mxu0 }
  0xfe   :  { %v432_v41 = vadd.f32 %v548_v24, %v383_v39  ;;  %v519_v42 = vadd.f32 %v518_v40, %v517_v38 }
 0x100   :  { %440 = vst [vmem:[#allocation5 + $0x10] sm:$0xff] %v432_v41  ;;  %v386_v43 = vadd.f32 %v519_v42, %v461_v22 }
 0x102   :  { %v435_v44 = vadd.f32 %v549_v31, %v386_v43 }
 0x104   :  { %441 = vst [vmem:[#allocation5 + $0x18] sm:$0xff] %v435_v44 }
 0x105   :  { %612 = shalt.err (!%p609_p9)
}
 0x106   :  { %s630_s16 = smov 128   ;;  %s631_s17 = smov 8  }
 0x107   :  { %453 = dma.vmem_to_hbm [thread:$0]  %s448_s4, 512, %s728_s5, [#allocation4], %s630_s16, %s630_s16, %s631_s17  }
 0x108   :  { %623 = dma.done.wait [#allocation4], 512  }
 0x109   :  { %624 = vsyncadd [#allocation4], 4294966784 }
 0x10a   :  { %457 = vsyncpa [#allocation3], 1 }
 0x10b   :  { %458 = vsyncpa [#allocation4], 1 }

</bundles_post_ra>
